<compile_context>
chip_gen: v5e
topology: v5e:2x2
jax: 0.10.0
libtpu: 0.0.40
codegen_flags: <defaults>
</compile_context>

<pallas_src>
import jax
import jax.numpy as jnp
from jax.experimental import pallas as pl
from jax.experimental.pallas import tpu as pltpu


def _vmem_capacity_bytes() -> int:
    """Physical VMEM per core; falls back to 128 MiB if the query fails."""
    try:
        info = pltpu.get_tpu_info()
        cap = getattr(info, "vmem_capacity_bytes", None)
        if cap:
            return int(cap)
    except Exception:
        pass
    return 128 << 20


def _target_out_block_bytes(vmem_cap: int) -> int:
    """Output-block byte budget, generation aware.

    v7x (64 MiB VMEM, ~3.2 TB/s HBM): bigger blocks so DMA time dwarfs the
    fixed per-step overhead, while 2*(in+out) stays well under ~28 MiB.
    v5e/v6e (128 MiB VMEM): ~4 MiB blocks already sit at ~85% of roofline.
    """
    if vmem_cap <= (64 << 20):   # v7x-class
        return 7 << 20
    return 4 << 20


def _pick_tile(full_dim: int, other_dim: int, itemsize: int, unit: int,
               target_bytes: int) -> int:
    """Largest tile along `full_dim` (multiple of `unit`, or the whole dim)
    keeping one OUTPUT block near `target_bytes`.  May exceed the target when
    it floors at `unit`; the caller derives vmem_limit_bytes from the real
    block sizes so that case still compiles and double-buffers."""
    if full_dim * other_dim * itemsize <= target_bytes:
        return full_dim
    tile = max(unit, (target_bytes // (other_dim * itemsize)) // unit * unit)
    return full_dim if tile >= full_dim else tile


def pad_to_square(image: jax.Array, fill=0, padding_mode: str = "constant") -> jax.Array:
    """Pallas implementation of PadToSquare.forward for a CHW tensor.

    `fill` is baked in as a compile-time constant (it is a module attribute in
    the reference implementation).
    """
    if padding_mode != "constant":
        # TODO(synk): 'reflect'/'replicate' padding modes not implemented (module default is 'constant').
        raise NotImplementedError("only padding_mode='constant' is supported")

    C, H, W = image.shape
    if H == W:
        return image

    itemsize = jnp.dtype(image.dtype).itemsize
    vmem_cap = _vmem_capacity_bytes()
    target_bytes = _target_out_block_bytes(vmem_cap)
    # Sub-32-bit dtypes pack along sublanes: bf16 -> 16 rows/vreg, int8 -> 32.
    sublane_unit = 8 * max(1, 4 // itemsize)

    if H > W:
        # ---- Pad the lane (last) axis on both sides; tile the row axis. ----
        pad = (H - W) // 2
        if pad == 0:  # |H - W| == 1: F.pad with zero padding is an identity copy.
            return image
        out_h, out_w = H, W + 2 * pad
        tile_h = _pick_tile(H, out_w, itemsize, unit=sublane_unit,
                            target_bytes=target_bytes)
        grid = (pl.cdiv(H, tile_h), C)          # spatial axis leading (v7x balance)

        in_block_bytes = tile_h * W * itemsize
        out_block_bytes = tile_h * out_w * itemsize

        def kernel(x_ref, o_ref):
            # Build the padded tile in registers once -> single lane-dense
            # full-block store (no interior double write, no full-tile fill).
            strip = jnp.full((1, tile_h, pad), fill, dtype=o_ref.dtype)
            o_ref[...] = jnp.concatenate([strip, x_ref[...], strip], axis=2)

        in_spec = pl.BlockSpec((1, tile_h, W), lambda t, c: (c, t, 0))
        out_spec = pl.BlockSpec((1, tile_h, out_w), lambda t, c: (c, t, 0))
    else:
        # ---- Pad the row (sublane) axis on both sides; tile the lane axis
        # (unchanged between input and output, so blocks stay aligned). ------
        pad = (W - H) // 2
        if pad == 0:
            return image
        out_h, out_w = H + 2 * pad, W
        tile_w = _pick_tile(W, out_h, itemsize, unit=128,
                            target_bytes=target_bytes)
        grid = (pl.cdiv(W, tile_w), C)          # spatial axis leading (v7x balance)

        in_block_bytes = H * tile_w * itemsize
        out_block_bytes = out_h * tile_w * itemsize

        def kernel(x_ref, o_ref):
            # Three full-lane-width stores; each output element written once.
            # The sublane-boundary masking at `pad` is VMEM-side work hidden
            # under the HBM DMA in this memory-bound regime.
            strip = jnp.full((1, pad, tile_w), fill, dtype=o_ref.dtype)
            o_ref[:, :pad, :] = strip
            o_ref[:, pad:pad + H, :] = x_ref[...]
            o_ref[:, pad + H:, :] = strip

        in_spec = pl.BlockSpec((1, H, tile_w), lambda t, c: (c, 0, t))
        out_spec = pl.BlockSpec((1, out_h, tile_w), lambda t, c: (c, 0, t))

    # Scoped-VMEM request from the REAL block sizes (in + out, double-buffered)
    # plus headroom; clamp to physical capacity.
    vmem_limit = min(2 * (in_block_bytes + out_block_bytes) + (2 << 20), vmem_cap)

    cost = pl.CostEstimate(
        flops=0,
        transcendentals=0,
        bytes_accessed=C * (H * W + out_h * out_w) * itemsize,
    )

    return pl.pallas_call(
        kernel,
        out_shape=jax.ShapeDtypeStruct((C, out_h, out_w), image.dtype),
        grid=grid,
        in_specs=[in_spec],
        out_specs=out_spec,
        compiler_params=pltpu.CompilerParams(
            dimension_semantics=("parallel", "parallel"),
            vmem_limit_bytes=vmem_limit),
        cost_estimate=cost,
    )(image)


if __name__ == "__main__":
    key = jax.random.PRNGKey(0)
    k1, k2, k3, k4, k5 = jax.random.split(key, 5)

    # Case 1: H > W  -> pad width (lane axis) on both sides.
    img1 = jax.random.normal(k1, (4, 16, 8), dtype=jnp.float32)
    out1 = jax.block_until_ready(pad_to_square(img1, fill=0))
    ref1 = jnp.pad(img1, ((0, 0), (0, 0), (4, 4)))
    assert out1.shape == (4, 16, 16), out1.shape
    assert jnp.array_equal(out1, ref1), "mismatch vs reference (H > W case)"

    # Case 2: W > H  -> pad height (row axis) on both sides, nonzero fill.
    img2 = jax.random.normal(k2, (4, 8, 16), dtype=jnp.float32)
    out2 = jax.block_until_ready(pad_to_square(img2, fill=1.5))
    ref2 = jnp.pad(img2, ((0, 0), (4, 4), (0, 0)), constant_values=1.5)
    assert out2.shape == (4, 16, 16), out2.shape
    assert jnp.array_equal(out2, ref2), "mismatch vs reference (W > H case)"

    # Case 3: H == W -> identity (no kernel launch, matches torch early return).
    img3 = jax.random.normal(k3, (4, 16, 16), dtype=jnp.float32)
    out3 = jax.block_until_ready(pad_to_square(img3))
    assert jnp.array_equal(out3, img3)

    # Case 4: odd difference -> torch pads (diff // 2) on both sides (off-square).
    img4 = jax.random.normal(k4, (3, 17, 8), dtype=jnp.float32)
    out4 = jax.block_until_ready(pad_to_square(img4, fill=0))
    ref4 = jnp.pad(img4, ((0, 0), (0, 0), (4, 4)))
    assert out4.shape == (3, 17, 16), out4.shape
    assert jnp.array_equal(out4, ref4), "mismatch vs reference (odd-diff case)"

    # Case 5: bf16 (packed sublanes exercise the dtype-aware tiling unit).
    img5 = jax.random.normal(k5, (3, 32, 16), dtype=jnp.bfloat16)
    out5 = jax.block_until_ready(pad_to_square(img5, fill=0))
    ref5 = jnp.pad(img5, ((0, 0), (0, 0), (8, 8)))
    assert out5.shape == (3, 32, 32), out5.shape
    assert jnp.array_equal(out5, ref5), "mismatch vs reference (bf16 case)"

    print("KERNEL_OK")
</pallas_src>

<mosaic_0001>
module attributes {stable_mosaic.version = 11 : i64} {
  func.func @kernel(%arg0: i32, %arg1: i32, %arg2: memref<1x16x8xf32, #tpu.memory_space<vmem>>, %arg3: memref<1x16x16xf32, #tpu.memory_space<vmem>>) attributes {dimension_semantics = [#tpu.dimension_semantics<parallel>, #tpu.dimension_semantics<parallel>], iteration_bounds = array<i64: 1, 4>, scalar_prefetch = 0 : i64, scratch_operands = 0 : i64, tpu.core_type = #tpu.core_type<tc>, window_params = [{transform_indices = @transform_0, window_bounds = array<i64: 1, 16, 8>}, {transform_indices = @transform_1, window_bounds = array<i64: 1, 16, 16>}]} {
    %cst = arith.constant 0.000000e+00 : f32
    %0 = vector.broadcast %cst : f32 to vector<1x16x4xf32>
    %c0 = arith.constant 0 : index
    %c0_0 = arith.constant 0 : index
    %c0_1 = arith.constant 0 : index
    %1 = vector.load %arg2[%c0, %c0_0, %c0_1] : memref<1x16x8xf32, #tpu.memory_space<vmem>>, vector<1x16x8xf32>
    %2 = tpu.concatenate %0, %1, %0 in 2 : vector<1x16x4xf32>, vector<1x16x8xf32>, vector<1x16x4xf32> -> vector<1x16x16xf32>
    %c0_2 = arith.constant 0 : index
    %c0_3 = arith.constant 0 : index
    %c0_4 = arith.constant 0 : index
    %3 = vector.load %arg3[%c0_2, %c0_3, %c0_4] : memref<1x16x16xf32, #tpu.memory_space<vmem>>, vector<1x16x16xf32>
    tpu.vector_store %arg3[%c0_2, %c0_3, %c0_4], %2 {strides = array<i32>} : memref<1x16x16xf32, #tpu.memory_space<vmem>>, vector<1x16x16xf32>,
    return
  }
  func.func @transform_0(%arg0: i32, %arg1: i32) -> (i32, i32, i32) {
    %c0_i32 = arith.constant 0 : i32
    %c0_i32_0 = arith.constant 0 : i32
    return %arg1, %arg0, %c0_i32 : i32, i32, i32
  }
  func.func @transform_1(%arg0: i32, %arg1: i32) -> (i32, i32, i32) {
    %c0_i32 = arith.constant 0 : i32
    %c0_i32_0 = arith.constant 0 : i32
    return %arg1, %arg0, %c0_i32 : i32, i32, i32
  }
}

</mosaic_0001>

<bundles_post_ra>
// kernel: tpu_custom_call.1
= control target key start
LH: loop header
LB: loop body
LE: loop exit
PB: predicated region body
PF: predicated region fallthrough
CT: control target
= control target key end

     0   :  { %6 = vsyncpa [#allocation3], 0  ;;  %s525_s0 = inlined_call_operand.vmem [shape: f32[4,16,8], index: 0, kind: input, shape index: {}]   ;;  %s526_s1 = inlined_call_operand.hbm [shape: f32[4,16,16], index: 1, kind: output, shape index: {}]  }
   0x1   :  { %8 = vsyncpa [#allocation3 + $0x1], 0  ;;  %s428_s6 = smov 0   ;;  %s430_s7 = smov 0  }
   0x2   :  { %s432_s8 = smov 0   ;;  %s434_s9 = smov 0  }
   0x3   :  { %s436_s10 = smov 0   ;;  %s438_s11 = smov 0  }
   0x4 LB: > { %s262_s12 = sadd.s32 4294967295, %s413_s11   ;;  %s263_s13 = sadd.s32 4294967294, %s413_s11   ;;  %s413_s11 = sphi %s438_s11, %s14_s11   ;;  %s409_s10 = sphi %s436_s10, %s533_s10   ;;  %s405_s9 = sphi %s434_s9, %s532_s9   ;;  %s401_s8 = sphi %s432_s8, %s531_s8   ;;  %s397_s7 = sphi %s430_s7, %s530_s7   ;;  %s393_s6 = sphi %s428_s6, %s529_s6  }
   0x5   : > { %s23_s14 = sadd.s32 1, %s409_s10  ;;  %s63_s15 = sadd.s32 1, %s401_s8 }
   0x6   : > { %p24_p0 = scmp.ge.s32.totalorder %s23_s14, 4  ;;  %p73_p1 = scmp.ne.s32.totalorder %s401_s8, %s397_s7 }
   0x7   : > { %p74_p2 = scmp.eq.s32.totalorder %s262_s12, 3  ;;  %p79_p3 = scmp.ne.s32.totalorder %s397_s7, %s393_s6 }
   0x8   : > { %s535_s14 = smov (%p24_p0, %s23_s14), 0  ;;  %p80_p5 = scmp.eq.s32.totalorder %s263_s13, 3 }
   0x9   : > { %p468_p4 = por %p74_p2, %p73_p1  ;;  %s58_s17 = ssub.s32 %s409_s10, %s535_s14 }
   0xa   : > { %p266_p6 = scmp.ge.s32.totalorder %s413_s11, 1  ;;  %p61_p7 = scmp.eq.s32.totalorder %s58_s17, 0 }
   0xb   : > { %p475_p8 = por %p80_p5, %p79_p3  ;;  %p111_p9 = scmp.lt.s32.totalorder %s413_s11, 5 }
   0xc   : > { %s481_s19 = scalar_select %p61_p7, %s401_s8, %s63_s15  }
   0xd   : > { %p112_p10 = pnand %p266_p6, %p111_p9 }
   0xe   : > { %p136_p11 = scmp.lt.s32.totalorder (!%p112_p10), %s405_s9, 3  ;;  %s415_s25 = smov (!%p112_p10), 4  }
   0xf   : > { %115 = sbr.rel (%p112_p10) target bundleno = 154 (0x9a), region = 24  ;;  %s132_s26 = sand.u32 (!%p112_p10), 1, %s397_s7  }
  0x10   : > { %s267_s27 = sshll.u32 (!%p112_p10), %s132_s26, 4  ;;  %s276_s28 = sshll.u32 (!%p112_p10), %s405_s9, 4 }
  0x11   : > { %s134_s29 = scalar_lea.vmem (!%p112_p10), [#allocation2], %s267_s27  ;;  %s179_s3 = scalar_lea.hbm (!%p112_p10), %s526_s1, %s276_s28 }
  0x12   : > { %s180_s4 = sshll.u32 (!%p112_p10), %s134_s29, 4  ;;  %s182_s5 = sshll.u32 (!%p112_p10), %s179_s3, 4  ;;  %s181_s4 = int_to_ptr.vmem [resolvable:$true] %s180_s4  ;;  %s183_s5 = int_to_ptr.hbm [resolvable:$true] %s182_s5 }
  0x13   : > { %s166_s12 = scalar_lea.sflag (!%p112_p10), [#allocation3], %s132_s26  ;;  %s349_s13 = sshra.s32 (!%p112_p10), %s183_s5, 4  ;;  %s350_s13 = int_to_ptr.hbm [resolvable:$true] %s349_s13 }
  0x14   : > { %s137_s20 = scalar_select %p136_p11, %s405_s9, 3  ;;  %vm156_vm0 = vcmask 31744   ;;  %vm159_vm1 = vcmask 97280   ;;  %vm162_vm2 = vcmask 130048  }
  0x15   : > { %s351_s9 = scalar_lea.hbm %s350_s13, 16  ;;  %p356_p1 = scmp.lt.s32.totalorder %s350_s13, %s526_s1 }
  0x16   : > { %s275_s21 = sshll.u32 %s137_s20, 4  ;;  %p352_p12 = scmp.ne.s32.totalorder %s350_s13, %s351_s9 }
  0x17   : > { %s143_s24 = scalar_lea.vmem %s525_s0, %s275_s21  ;;  %s355_s20 = scalar_lea.hbm %s526_s1, 64 }
  0x18   : > { %v146_v0 = vld [vmem:[%s143_s24] sm:$0xff]  ;;  %v147_v1 = vld [vmem:[%s143_s24 + $0x8] sm:$0xff]  ;;  %p353_p13 = pnand %p352_p12, %p468_p4  ;;  %p357_p2 = scmp.lt.s32.totalorder %s355_s20, %s351_s9 }
  0x19   : > { %150 = vrot.lane.b32.xlu0 %v146_v0, %s415_s25 }
  0x1a   : > { %p354_p0 = pneg %p353_p13  ;;  %p358_p3 = por %p357_p2, %p356_p1 }
  0x1c   : > { %p359_p5 = pnand %p358_p3, %p354_p0 }
  0x21   : > { %152 = vrot.lane.b32.xlu0 %v147_v1, %s415_s25 }
  0x8b   : > { %v151_v2 = vpop.permute.xlu0 %150 }
  0x8c   : > { %v157_v3 = vsel %vm156_vm0, 0.0, %v151_v2 }
  0x8d   : > { %v160_v4 = vsel %vm159_vm1, %v157_v3, 0.0 }
  0x8e   : > { %163 = vst.msk [vmem:[%s134_s29] sm:$0xff] %vm162_vm2, %v160_v4 }
  0x93   : > { %v153_v5 = vpop.permute.xlu0 %152 }
  0x94   : > { %v158_v6 = vsel %vm156_vm0, 0.0, %v153_v5 }
  0x95   : > { %v161_v7 = vsel %vm159_vm1, %v158_v6, 0.0 }
  0x96   : > { %164 = vst.msk [vmem:[%s134_s29 + $0x8] sm:$0xff] %vm162_vm2, %v161_v7 }
  0x97   : > { %362 = shalt.err (!%p359_p5)
}
  0x98   : > { %s416_s23 = smov 128   ;;  %s417_s24 = smov 8  }
  0x99   : > { %277 = dma.vmem_to_hbm [thread:$0]  (%p468_p4), %s181_s4, 256, %s183_s5, %s166_s12, %s416_s23, %s416_s23, %s417_s24  }
  0x9a PF: > { %p283_p6 = scmp.ge.s32.totalorder %s413_s11, 2  ;;  %s197_s25 = sand.u32 1, %s393_s6  }
  0x9b   : > { %s198_s26 = scalar_lea.sflag [#allocation3], %s197_s25 }
  0x9c   : > { %p280_p7 = pnand %p283_p6, %p475_p8 }
  0x9e   : > { %p281_p9 = pneg %p280_p7 }
  0xa0   : > { %388 = dma.done.wait (%p281_p9), %s198_s26, 256  }
  0xa1   : > { %390 = vsyncadd (%p281_p9), %s198_s26, 4294967040  ;;  %s14_s11 = sadd.s32 1, %s413_s11   ;;  %s529_s6 = smov %s397_s7 }
  0xa2   : > { %p11_p10 = scmp.ge.s32.totalorder %s14_s11, 6   ;;  %s530_s7 = smov %s401_s8 }
  0xa3   : > { %s531_s8 = smov %s481_s19  ;;  %s532_s9 = smov %s409_s10 }
  0xa4   : > { %s533_s10 = smov %s535_s14  ;;  %13 = sbr.rel (!%p11_p10) target bundleno = 4 (0x4), region = 59 }
  0xa9   :  { %204 = vsyncpa [#allocation3], 1 }
  0xaa   :  { %206 = vsyncpa [#allocation3 + $0x1], 1 }

</bundles_post_ra>
